<compile_context>
chip_gen: v6e
topology: v6e:2x2x1
jax: 0.10.0
libtpu: 0.0.40
codegen_flags: <defaults>
</compile_context>

<pallas_src>
import functools

import jax
import jax.numpy as jnp
from jax import lax
from jax.experimental import pallas as pl
from jax.experimental.pallas import tpu as pltpu


_MAX_BATCH_FOLD = 64   # cap on images folded into one grid step


def _round_up(v, m):
    return (v + m - 1) // m * m


def _largest_divisor_at_most(n, cap):
    cap = max(1, min(n, cap))
    for d in range(cap, 0, -1):
        if n % d == 0:
            return d
    return 1


def _vmem_capacity_bytes():
    try:
        return int(pltpu.get_tpu_info().vmem_capacity_bytes)
    except Exception:  # conservative fallback: v7x per-TC VMEM
        return 64 * 1024 * 1024


def _logits_vpu(x, w_col):
    """Per-pixel 1x1-conv logit sum_c w[c]*x[b,c,s] on the VPU (lane-broadcast
    multiply + sublane reduce over C), keeping the MXU free for the
    weighted-context contraction."""
    prod = x.astype(jnp.float32) * w_col            # (Bb, C, HWb) f32
    return jnp.sum(prod, axis=1, keepdims=True)     # (Bb, 1, HWb) f32


def _attention2d_onepass_kernel(w_ref, x_ref, o_ref):
    # w_ref : (C, 1)       f32  -- 1x1 conv weight, channel on sublane axis
    # x_ref : (Bb, C, HW)  VMEM -- Bb whole images, native dtype
    # o_ref : (Bb, 1, C)   VMEM -- pooled context, lane-dense in C
    x = x_ref[...]
    c = x.shape[1]
    w_col = w_ref[...].reshape(1, c, 1)             # f32, no relayout

    logits = _logits_vpu(x, w_col)                  # (Bb, 1, HW) f32
    m = jnp.max(logits, axis=-1, keepdims=True)     # (Bb, 1, 1)
    p = jnp.exp(logits - m)                         # (Bb, 1, HW)
    denom = jnp.sum(p, axis=-1, keepdims=True)      # (Bb, 1, 1)

    # Weighted spatial reduction on the MXU; standard flash-attention
    # 'q @ k^T' contraction form -> lane-dense (Bb, 1, C) row directly.
    ctx = jnp.einsum('bos,bcs->boc', p.astype(x.dtype), x,
                     preferred_element_type=jnp.float32)
    o_ref[...] = (ctx / denom).astype(o_ref.dtype)


def _attention2d_tiled_kernel(w_ref, x_ref, o_ref, m_sc, l_sc, acc_sc, *,
                              hw_total, hw_blk, mask_tail):
    # Online softmax over spatial tiles (one image per batch step).
    # w_ref : (C, 1) f32;  x_ref : (1, C, hw_blk);  o_ref : (1, 1, C)
    # m_sc/l_sc : (1,1,1) f32;  acc_sc : (1,1,C) f32
    k = pl.program_id(1)

    @pl.when(k == 0)
    def _():
        m_sc[...] = jnp.full_like(m_sc, -jnp.inf)
        l_sc[...] = jnp.zeros_like(l_sc)
        acc_sc[...] = jnp.zeros_like(acc_sc)

    x = x_ref[...]                                  # (1, C, hw_blk)
    c = x.shape[1]
    if mask_tail:
        # The last spatial block may run past HW: zero the padded lanes of x
        # (protects the matmul from stale/garbage VMEM) and force their
        # logits to -inf so they contribute nothing to the softmax.
        lane = lax.broadcasted_iota(jnp.int32, (1, 1, hw_blk), 2)
        valid = (k * hw_blk + lane) < hw_total      # (1, 1, hw_blk)
        x = jnp.where(valid, x, jnp.zeros((), x.dtype))

    w_col = w_ref[...].reshape(1, c, 1)
    logits = _logits_vpu(x, w_col)                  # (1, 1, hw_blk) f32
    if mask_tail:
        logits = jnp.where(valid, logits, -jnp.inf)

    m_prev = m_sc[...]
    m_new = jnp.maximum(m_prev, jnp.max(logits, axis=-1, keepdims=True))
    alpha = jnp.exp(m_prev - m_new)
    p = jnp.exp(logits - m_new)
    l_sc[...] = alpha * l_sc[...] + jnp.sum(p, axis=-1, keepdims=True)
    acc_sc[...] = alpha * acc_sc[...] + jnp.einsum(
        'bos,bcs->boc', p.astype(x.dtype), x,
        preferred_element_type=jnp.float32)
    m_sc[...] = m_new

    @pl.when(k == pl.num_programs(1) - 1)
    def _():
        # Deferred normalization: one divide of the C-length accumulator.
        o_ref[...] = (acc_sc[...] / l_sc[...]).astype(o_ref.dtype)


def attention2d(x, weight, bias=None, *, block_budget_bytes=None):
    """x: (B, C, H, W); weight: (1, C, 1, 1); bias: (1,). Returns (B, C, 1, 1)."""
    del bias  # scalar shift of the single logit channel cancels in the softmax
    b, c, h, w = x.shape
    hw = h * w
    x_flat = x.reshape(b, c, hw)                    # native dtype, no upcast
    w_col = weight.reshape(c, 1).astype(jnp.float32)

    itemsize = jnp.dtype(x_flat.dtype).itemsize
    c_sub = _round_up(c, 8)                         # sublane-padded channels
    c_lane = _round_up(c, 128)                      # lane-padded (for (.,1,C))
    hw_lane = _round_up(hw, 128)
    img_bytes = c_sub * hw_lane * itemsize          # padded VMEM bytes / image

    # Generation-aware per-step block budget: ~vmem/6 (clamped 4..16 MiB) so
    # double-buffered in + out + weight + scratch stays well inside v7x's
    # 64 MiB while v5e/v6e get ~16 MiB streaming blocks.
    vmem_cap = _vmem_capacity_bytes()
    if block_budget_bytes is None:
        block_budget_bytes = min(16 << 20, max(4 << 20, vmem_cap // 6))

    tile_hw = img_bytes > block_budget_bytes
    hw_blk = hw
    if tile_hw:
        hw_blk = (block_budget_bytes // max(1, c_sub * itemsize)) // 128 * 128
        hw_blk = max(128, hw_blk)
        if hw_blk >= hw:
            tile_hw = False
            hw_blk = hw

    if not tile_hw:
        # One-pass path: whole spatial extent per step; fold several images.
        max_fold = max(1, block_budget_bytes // max(1, img_bytes))
        max_fold = min(max_fold, _MAX_BATCH_FOLD)
        if b >= 2:
            max_fold = min(max_fold, b // 2)        # keep grid[0] >= 2 (v7x)
        b_blk = _largest_divisor_at_most(b, max_fold)
        grid = (b // b_blk,)
        kernel = _attention2d_onepass_kernel
        in_specs = [
            pl.BlockSpec((c, 1), lambda i: (0, 0)),
            pl.BlockSpec((b_blk, c, hw), lambda i: (i, 0, 0)),
        ]
        out_spec = pl.BlockSpec((b_blk, 1, c), lambda i: (i, 0, 0))
        scratch_shapes = []
        dim_semantics = ("parallel",)
        x_blk_bytes = b_blk * img_bytes
        scratch_bytes = 0
    else:
        # HW-tiled path: online softmax over spatial tiles, one image per
        # batch step so scratch padding is negligible.
        b_blk = 1
        num_k = -(-hw // hw_blk)
        mask_tail = (hw % hw_blk) != 0
        grid = (b, num_k)
        kernel = functools.partial(_attention2d_tiled_kernel, hw_total=hw,
                                   hw_blk=hw_blk, mask_tail=mask_tail)
        in_specs = [
            pl.BlockSpec((c, 1), lambda i, k: (0, 0)),
            pl.BlockSpec((1, c, hw_blk), lambda i, k: (i, 0, k)),
        ]
        out_spec = pl.BlockSpec((1, 1, c), lambda i, k: (i, 0, 0))
        scratch_shapes = [
            pltpu.VMEM((1, 1, 1), jnp.float32),     # running max
            pltpu.VMEM((1, 1, 1), jnp.float32),     # running sum
            pltpu.VMEM((1, 1, c), jnp.float32),     # context accumulator
        ]
        dim_semantics = ("parallel", "arbitrary")
        x_blk_bytes = c_sub * hw_blk * itemsize
        scratch_bytes = 2 * 8 * 128 * 4 + 8 * c_lane * 4

    # Explicit VMEM limit: double-buffered x / out / weight blocks + scratch
    # + headroom, clamped to physical VMEM (v5e default scope is only 16 MiB).
    out_blk_bytes = b_blk * 8 * c_lane * itemsize
    w_bytes = c_sub * 128 * 4
    need = 2 * (x_blk_bytes + out_blk_bytes + w_bytes) + scratch_bytes
    vmem_limit = max(need + (8 << 20), 32 << 20)
    vmem_limit = int(min(vmem_limit, vmem_cap - (2 << 20)))
    vmem_limit = max(vmem_limit, need)              # never below actual need

    out = pl.pallas_call(
        kernel,
        out_shape=jax.ShapeDtypeStruct((b, 1, c), x_flat.dtype),
        grid=grid,
        in_specs=in_specs,
        out_specs=out_spec,
        scratch_shapes=scratch_shapes,
        compiler_params=pltpu.CompilerParams(
            dimension_semantics=dim_semantics,
            vmem_limit_bytes=vmem_limit),
    )(w_col, x_flat)
    return out.reshape(b, c, 1, 1)


def attention2d_ref(x, weight, bias):
    """Pure-JAX reference mirroring the PyTorch forward (with bias)."""
    b, c, h, w = x.shape
    logits = jnp.einsum('bchw,c->bhw', x, weight.reshape(c)) + bias[0]
    probs = jax.nn.softmax(logits.reshape(b, h * w), axis=-1)
    ctx = jnp.einsum('bcs,bs->bc', x.reshape(b, c, h * w), probs)
    return ctx.reshape(b, c, 1, 1)


if __name__ == "__main__":
    key = jax.random.PRNGKey(0)
    kx, kw, kb, kx3, kw3 = jax.random.split(key, 5)

    # Case 1: 16x16 feature map (one-pass path, HW = 256).
    B, C, H, W = 2, 4, 16, 16
    x = jax.random.normal(kx, (B, C, H, W), dtype=jnp.float32)
    bound = 1.0 / (C ** 0.5)
    conv_w = jax.random.uniform(kw, (1, C, 1, 1), minval=-bound, maxval=bound,
                                dtype=jnp.float32)
    conv_b = jax.random.uniform(kb, (1,), minval=-bound, maxval=bound,
                                dtype=jnp.float32)

    out = jax.block_until_ready(attention2d(x, conv_w, conv_b))
    ref = attention2d_ref(x, conv_w, conv_b)
    assert out.shape == (B, C, 1, 1), out.shape
    assert jnp.allclose(out, ref, atol=1e-5, rtol=1e-5), (
        f"max abs err = {float(jnp.max(jnp.abs(out - ref)))}")

    # Case 2: 7x7 feature map (HW = 49, non-128-aligned full block).
    x2 = jax.random.normal(kx, (B, C, 7, 7), dtype=jnp.float32)
    out2 = jax.block_until_ready(attention2d(x2, conv_w, conv_b))
    ref2 = attention2d_ref(x2, conv_w, conv_b)
    assert jnp.allclose(out2, ref2, atol=1e-5, rtol=1e-5), (
        f"max abs err (7x7) = {float(jnp.max(jnp.abs(out2 - ref2)))}")

    # Case 3: force the HW-tiled online-softmax path (incl. masked tail block)
    # by shrinking the block budget: HW = 16*17 = 272 -> 128-lane tiles + tail.
    B3, C3, H3, W3 = 2, 8, 16, 17
    x3 = jax.random.normal(kx3, (B3, C3, H3, W3), dtype=jnp.float32)
    bound3 = 1.0 / (C3 ** 0.5)
    conv_w3 = jax.random.uniform(kw3, (1, C3, 1, 1), minval=-bound3,
                                 maxval=bound3, dtype=jnp.float32)
    conv_b3 = jnp.zeros((1,), jnp.float32)
    out3 = jax.block_until_ready(
        attention2d(x3, conv_w3, conv_b3, block_budget_bytes=4096))
    ref3 = attention2d_ref(x3, conv_w3, conv_b3)
    assert jnp.allclose(out3, ref3, atol=1e-5, rtol=1e-5), (
        f"max abs err (tiled) = {float(jnp.max(jnp.abs(out3 - ref3)))}")

    print("KERNEL_OK")
</pallas_src>

<mosaic_0001>
module attributes {stable_mosaic.version = 11 : i64} {
  func.func @_attention2d_onepass_kernel(%arg0: i32, %arg1: memref<4x1xf32, #tpu.memory_space<vmem>>, %arg2: memref<1x4x256xf32, #tpu.memory_space<vmem>>, %arg3: memref<1x1x4xf32, #tpu.memory_space<vmem>>) attributes {dimension_semantics = [#tpu.dimension_semantics<parallel>], iteration_bounds = array<i64: 2>, scalar_prefetch = 0 : i64, scratch_operands = 0 : i64, tpu.core_type = #tpu.core_type<tc>, window_params = [{pipeline_mode = #tpu.pipeline_mode<synchronous>, transform_indices = @transform_0, window_bounds = array<i64: 4, 1>}, {transform_indices = @transform_1, window_bounds = array<i64: 1, 4, 256>}, {transform_indices = @transform_2, window_bounds = array<i64: 1, 1, 4>}]} {
    %c0 = arith.constant 0 : index
    %c0_0 = arith.constant 0 : index
    %c0_1 = arith.constant 0 : index
    %0 = vector.load %arg2[%c0, %c0_0, %c0_1] : memref<1x4x256xf32, #tpu.memory_space<vmem>>, vector<1x4x256xf32>
    %c0_2 = arith.constant 0 : index
    %c0_3 = arith.constant 0 : index
    %1 = vector.load %arg1[%c0_2, %c0_3] : memref<4x1xf32, #tpu.memory_space<vmem>>, vector<4x1xf32>
    %2 = vector.shape_cast %1 : vector<4x1xf32> to vector<1x4x1xf32>
    %3 = vector.broadcast %2 : vector<1x4x1xf32> to vector<1x4x256xf32>
    %4 = arith.mulf %0, %3 : vector<1x4x256xf32>
    %cst = arith.constant dense<0.000000e+00> : vector<1x256xf32>
    %5 = vector.multi_reduction <add>, %4, %cst [1] : vector<1x4x256xf32> to vector<1x256xf32>
    %6 = vector.shape_cast %5 : vector<1x256xf32> to vector<1x1x256xf32>
    %cst_4 = arith.constant dense<0xFF800000> : vector<1x1xf32>
    %7 = vector.multi_reduction <maximumf>, %6, %cst_4 [2] : vector<1x1x256xf32> to vector<1x1xf32>
    %8 = vector.shape_cast %7 : vector<1x1xf32> to vector<1x1x1xf32>
    %9 = vector.broadcast %8 : vector<1x1x1xf32> to vector<1x1x256xf32>
    %10 = arith.subf %6, %9 : vector<1x1x256xf32>
    %11 = math.exp %10 : vector<1x1x256xf32>
    %cst_5 = arith.constant dense<0.000000e+00> : vector<1x1xf32>
    %12 = vector.multi_reduction <add>, %11, %cst_5 [2] : vector<1x1x256xf32> to vector<1x1xf32>
    %13 = vector.shape_cast %12 : vector<1x1xf32> to vector<1x1x1xf32>
    "tpu.trace_start"() <{level = 10 : i32, message = "bos,bcs->boc"}> : () -> ()
    %cst_6 = arith.constant dense<0.000000e+00> : vector<1x1x4xf32>
    %14 = tpu.matmul %11, %0, %cst_6 {dimension_numbers = #tpu.dot_dimension_numbers<[2], [2], [1], [1], [0, 0, 0, 1, 1, 1], [0], [0]>} : vector<1x1x256xf32>, vector<1x4x256xf32>, vector<1x1x4xf32> -> vector<1x1x4xf32>
    "tpu.trace_stop"() : () -> ()
    %15 = vector.broadcast %13 : vector<1x1x1xf32> to vector<1x1x4xf32>
    %16 = arith.divf %14, %15 : vector<1x1x4xf32>
    %c0_7 = arith.constant 0 : index
    %c0_8 = arith.constant 0 : index
    %c0_9 = arith.constant 0 : index
    %17 = vector.load %arg3[%c0_7, %c0_8, %c0_9] : memref<1x1x4xf32, #tpu.memory_space<vmem>>, vector<1x1x4xf32>
    tpu.vector_store %arg3[%c0_7, %c0_8, %c0_9], %16 {strides = array<i32>} : memref<1x1x4xf32, #tpu.memory_space<vmem>>, vector<1x1x4xf32>,
    return
  }
  func.func @transform_0(%arg0: i32) -> (i32, i32) {
    %c0_i32 = arith.constant 0 : i32
    %c0_i32_0 = arith.constant 0 : i32
    %c0_i32_1 = arith.constant 0 : i32
    return %c0_i32, %c0_i32_0 : i32, i32
  }
  func.func @transform_1(%arg0: i32) -> (i32, i32, i32) {
    %c0_i32 = arith.constant 0 : i32
    %c0_i32_0 = arith.constant 0 : i32
    %c0_i32_1 = arith.constant 0 : i32
    return %arg0, %c0_i32, %c0_i32_0 : i32, i32, i32
  }
  func.func @transform_2(%arg0: i32) -> (i32, i32, i32) {
    %c0_i32 = arith.constant 0 : i32
    %c0_i32_0 = arith.constant 0 : i32
    %c0_i32_1 = arith.constant 0 : i32
    return %arg0, %c0_i32, %c0_i32_0 : i32, i32, i32
  }
}

</mosaic_0001>

<bundles_post_ra>
// kernel: tpu_custom_call.1
= control target key start
LH: loop header
LB: loop body
LE: loop exit
PB: predicated region body
PF: predicated region fallthrough
CT: control target
= control target key end

     0   :  { %7 = vsyncpa [#allocation3], 0  ;;  %s692_s0 = inlined_call_operand.vmem [shape: f32[4,1], index: 0, kind: input, shape index: {}]   ;;  %s693_s1 = inlined_call_operand.hbm [shape: f32[2,4,256], index: 1, kind: input, shape index: {}]   ;;  %s694_s2 = inlined_call_operand.hbm [shape: f32[2,1,4], index: 2, kind: output, shape index: {}]  }
   0x1   :  { %9 = vsyncpa [#allocation3 + $0x1], 0 }
   0x2   :  { %10 = vsyncpa [#allocation4], 0 }
   0x3   :  { %12 = vsyncpa [#allocation4 + $0x1], 0  ;;  %s541_s9 = smov 0   ;;  %s543_s10 = smov 0  }
   0x4   :  { %s545_s11 = smov 0   ;;  %s547_s12 = smov 0  }
   0x5 LB: > { %s562_s13 = sadd.s32 4294967295, %s520_s12   ;;  %s360_s14 = sadd.s32 4294967294, %s520_s12   ;;  %s520_s12 = sphi %s547_s12, %s711_s12   ;;  %s516_s11 = sphi %s545_s11, %s710_s11   ;;  %s512_s10 = sphi %s543_s10, %s709_s10   ;;  %s508_s9 = sphi %s541_s9, %s708_s9  }
   0x6   : > { %s566_s15 = sadd.s32 1, %s520_s12   ;;  %s46_s16 = sadd.s32 1, %s516_s11 }
   0x7   : > { %s43_s17 = ssub.s32 %s520_s12, %s566_s15  ;;  %p53_p0 = scmp.ne.s32.totalorder %s516_s11, %s512_s10 }
   0x8   : > { %p44_p1 = scmp.eq.s32.totalorder %s43_s17, 0  ;;  %p54_p2 = scmp.eq.s32.totalorder %s520_s12, 0 }
   0x9   : > { %p59_p3 = scmp.ne.s32.totalorder %s512_s10, %s508_s9  ;;  %p60_p4 = scmp.eq.s32.totalorder %s562_s13, 0 }
   0xa   : > { %s578_s18 = scalar_select %p44_p1, %s516_s11, %s46_s16  }
   0xb   : > { %p580_p5 = por %p54_p2, %p53_p0  ;;  %p584_p6 = por %p60_p4, %p59_p3 }
   0xc   : > { %p83_p7 = scmp.eq.s32.totalorder %s562_s13, 1  ;;  %p89_p8 = scmp.eq.s32.totalorder %s360_s14, 1 }
   0xd   : > { %s698_s20 = scalar_select %p584_p6, 1, 0 }
   0xe   : > { %p384_p10 = scmp.lt.s32.totalorder %s520_s12, 2  ;;  %p591_p11 = por %p83_p7, %p53_p0 }
   0xf   : > { %p595_p12 = por %p89_p8, %p59_p3  ;;  %s112_s23 = sand.u32 1, %s516_s11  }
  0x10   : > { %s699_s21 = scalar_select %p591_p11, 1, 0 }
  0x11   : > { %s700_s22 = scalar_select %p595_p12, 1, 0 }
  0x12   : > { %s371_s24 = sshll.u32 %s520_s12, 7  ;;  %s363_s25 = sshll.u32 %s112_s23, 3 }
  0x13   : > { %s604_s28 = scalar_lea.hbm %s693_s1, %s371_s24  ;;  %s116_s29 = scalar_lea.vmem [#allocation2], %s363_s25 }
  0x14   : > { %s124_s30 = sshll.u32 %s116_s29, 4  ;;  %p608_p13 = pnand %p384_p10, %p580_p5  ;;  %s612_s30 = int_to_ptr.vmem [resolvable:$true] %s124_s30 }
  0x15   : > { %s113_s4 = scalar_lea.sflag [#allocation3], %s112_s23  ;;  %s428_s5 = scalar_lea.hbm %s604_s28, 128 }
  0x16   : > { %p429_p2 = scmp.ne.s32.totalorder %s604_s28, %s428_s5  ;;  %p430_p3 = pneg %p608_p13 }
  0x17   : > { %s433_s8 = scalar_lea.hbm %s693_s1, 256  ;;  %p434_p5 = scmp.lt.s32.totalorder %s604_s28, %s693_s1 }
  0x18   : > { %p431_p4 = pnand %p430_p3, %p429_p2  ;;  %p435_p8 = scmp.lt.s32.totalorder %s433_s8, %s428_s5 }
  0x1a   : > { %p432_p7 = pneg %p431_p4  ;;  %p436_p10 = por %p435_p8, %p434_p5 }
  0x1c   : > { %p437_p9 = pnand %p436_p10, %p432_p7 }
  0x1e   : > { %440 = shalt.err (!%p437_p9)
}
  0x1f   : > { %s441_s17 = scalar_lea.vmem %s612_s30, 128  ;;  %s522_s19 = smov [#allocation2]  }
  0x20   : > { %p442_p0 = scmp.ne.s32.totalorder %s612_s30, %s441_s17  ;;  %s446_s23 = sshll.u32 %s522_s19, 4  ;;  %s447_s23 = int_to_ptr.vmem [resolvable:$false] %s446_s23 }
  0x21   : > { %s448_s24 = scalar_lea.vmem %s447_s23, 256  ;;  %p449_p4 = scmp.lt.s32.totalorder %s612_s30, %s447_s23 }
  0x22   : > { %p444_p1 = pnand %p442_p0, %p430_p3  ;;  %p450_p12 = scmp.lt.s32.totalorder %s448_s24, %s441_s17 }
  0x24   : > { %p445_p2 = pneg %p444_p1  ;;  %p451_p11 = por %p450_p12, %p449_p4 }
  0x26   : > { %p452_p6 = pnand %p451_p11, %p445_p2 }
  0x28   : > { %455 = shalt.err (!%p452_p6)
}
  0x29   : > { %379 = dma.hbm_to_vmem [thread:$0]  (!%p608_p13), %s604_s28, 128, %s612_s30, %s113_s4  }
  0x2a   : > { %p702_p9 = scmp.lt.s32.totalorder %s520_s12, 3  ;;  %p703_p7 = scmp.ge.s32.totalorder %s520_s12, 1 }
  0x2c   : > { %p130_p0 = pnand %p703_p7, %p702_p9 }
  0x2d   : > { %s639_s25 = sand.u32 (!%p130_p0), 1, %s512_s10   ;;  %p704_p6 = scmp.ne.s32.totalorder (!%p130_p0), %s698_s20, 0 }
  0x2e   : > { %133 = sbr.rel (%p130_p0) target bundleno = 565 (0x235), region = 28  ;;  %s367_s26 = sshll.u32 (!%p130_p0), %s639_s25, 3 }
  0x2f   : > { %s136_s27 = scalar_lea.sflag (!%p130_p0), [#allocation3], %s639_s25  ;;  %s139_s29 = scalar_lea.vmem (!%p130_p0), [#allocation2], %s367_s26 }
  0x33   : > { %499 = dma.done.wait (%p704_p6), %s136_s27, 128  }
  0x34   : > { %501 = vsyncadd (%p704_p6), %s136_s27, 4294967168  ;;  %v523_v0 = vmov 0   ;;  %v160_v1 = vld [vmem:[%s692_s0] sm:$0xf]  ;;  %v524_v2 = vmov 839922192   ;;  %v168_v4 = vlaneseq }
  0x35   : > { %420 = vset.pattern.permute.xlu0 %v523_v0  ;;  %v166_v3 = vunpack.c.l.s4 %v524_v2  ;;  %v159_v9 = vld [vmem:[%s139_s29] sm:$0xff]  ;;  %vm177_vm0 = vcmask 1043456   ;;  %s368_s20 = sshll.u32 %s562_s13, 4  ;;  %s158_s3 = scalar_lea.vmem [#allocation5], %s639_s25  ;;  %vm279_vm1 = vcmask 24576  }
  0x36   : > { %163 = vperm.xlu0 %420, %v160_v1   ;;  %v169_v6 = vshrl.u32 %v168_v4, 7  ;;  %v205_v28 = vcombine.high %v159_v9, %v159_v9  ;;  %s294_s4 = sshll.u32 %s158_s3, 4  ;;  %s655_s7 = scalar_lea.hbm %s694_s2, %s368_s20  ;;  %s295_s4 = int_to_ptr.vmem [resolvable:$true] %s294_s4 }
  0x37   : > { %v167_v5 = vunpack.c.0.s8 %v166_v3  ;;  %s282_s8 = scalar_lea.sflag [#allocation4], %s639_s25  ;;  %s456_s14 = scalar_lea.vmem %s295_s4, 16 }
  0x38   : > { %237 = vmatprep.subr.mxu0 %v205_v28  ;;  %p457_p11 = scmp.ne.s32.totalorder %s295_s4, %s456_s14  ;;  %p705_p12 = scmp.ne.s32.totalorder %s699_s21, 0 }
  0x39   : > { %v170_v7 = vsub.s32 %v167_v5, %v169_v6  ;;  %238 = vmatpush1.xpose.msra.mxu0 %v159_v9  ;;  %s525_s13 = smov [#allocation5]  }
  0x3a   : > { %p458_p13 = pnand %p457_p11, %p705_p12  ;;  %s460_s16 = sshll.u32 %s525_s13, 4  ;;  %s461_s16 = int_to_ptr.vmem [resolvable:$false] %s460_s16 }
  0x3b   : > { %s462_s17 = scalar_lea.vmem %s461_s16, 32  ;;  %p463_p3 = scmp.lt.s32.totalorder %s295_s4, %s461_s16 }
  0x3c   : > { %p459_p1 = pneg %p458_p13  ;;  %p464_p5 = scmp.lt.s32.totalorder %s462_s17, %s456_s14 }
  0x3e   : > { %p465_p8 = por %p464_p5, %p463_p3 }
  0x40   : > { %p466_p10 = pnand %p465_p8, %p459_p1 }
  0xb1   : > { %v164_v8 = vpop.permute.xlu0 %163 }
  0xb2   : > { %v171_v10 = vrot.slane %v164_v8, %v170_v7 }
  0xb4   : > { %v173_v11 = vmul.f32 %v171_v10, %v159_v9 }
  0xb6   : > { %v175_v12 = vcombine.high %v173_v11, %v173_v11  ;;  %v178_v13 = vsel %vm177_vm0, %v173_v11, 0.0 }
  0xb7   : > { %v179_v14 = vrot.slane %v178_v13, 4 }
  0xb8   : > { %v185_v15 = vsel %vm177_vm0, %v175_v12, 0.0 }
  0xb9   : > { %v180_v16 = vadd.f32 %v179_v14, %v178_v13  ;;  %v186_v17 = vrot.slane %v185_v15, 4 }
  0xbb   : > { %v181_v18 = vrot.slane %v180_v16, 2  ;;  %v187_v19 = vadd.f32 %v186_v17, %v185_v15 }
  0xbd   : > { %v182_v20 = vadd.f32 %v181_v18, %v180_v16  ;;  %v188_v21 = vrot.slane %v187_v19, 2 }
  0xbf   : > { %v183_v22 = vrot.slane %v182_v20, 1  ;;  %v189_v23 = vadd.f32 %v188_v21, %v187_v19 }
  0xc1   : > { %v190_v24 = vrot.slane %v189_v23, 1  ;;  %v184_v25 = vadd.f32 %v183_v22, %v182_v20 }
  0xc3   : > { %v191_v26 = vadd.f32 %v190_v24, %v189_v23 }
  0xc5   : > { %v192_v27 = vmax.f32 %v184_v25, %v191_v26 }
  0xc7   : > { %193 = vmax.xlane.f32.xlu0 %v192_v27 }
 0x150   : > { %v194_v29 = vpop.xlane.xlu0 %193 }
 0x151   : > { %v195_v30 = vsub.f32 %v184_v25, %v194_v29  ;;  %v196_v31 = vsub.f32 %v191_v26, %v194_v29 }
 0x153   : > { %v197_v32 = vmul.f32 1.442695, %v195_v30  ;;  %v199_v33 = vmul.f32 1.442695, %v196_v31 }
 0x155   : > { %422 = vpow2.f32 %v197_v32 }
 0x156   : > { %424 = vpow2.f32 %v199_v33 }
 0x162   : > { %v423_v34 = vpop.eup %422 }
 0x163   : > { %v425_v35 = vpop.eup %424 }
 0x164   : > { %271 = vmatprep.mubr.f32.mxu0 %v425_v35  ;;  %v201_v36 = vadd.f32 %v425_v35, %v423_v34 }
 0x165   : > { %272 = vmatmul.mubr.f32.vlgmr.msra.gmra.mxu0 %v423_v34 }
 0x166   : > { %202 = vadd.xlane.f32.xlu1 %v201_v36 }
 0x1ef   : > { %v203_v37 = vpop.xlane.xlu1 %202 }
 0x1f0   : > { %426 = vrcp.f32 %v203_v37 }
 0x1fd   : > { %v427_v38 = vpop.eup %426 }
 0x225   : > { %v273_v39 = vpop.f32.mrf.mxu0 }
 0x226   : > { %v278_v40 = vmul.f32 %v427_v38, %v273_v39 }
 0x227   : > { %v275_v41 = vpop.f32.mrf.mxu0 }
 0x228   : > { %280 = vst.msk [vmem:[%s158_s3] sm:$0x1] %vm279_vm1, %v278_v40 }
 0x229   : > { %469 = shalt.err (!%p466_p10)
}
 0x22a   : > { %s470_s19 = scalar_lea.hbm %s655_s7, 16  ;;  %s474_s25 = scalar_lea.hbm %s694_s2, 32 }
 0x22b   : > { %p471_p2 = scmp.ne.s32.totalorder %s655_s7, %s470_s19  ;;  %p475_p7 = scmp.lt.s32.totalorder %s655_s7, %s694_s2 }
 0x22c   : > { %p476_p0 = scmp.lt.s32.totalorder %s474_s25, %s470_s19 }
 0x22d   : > { %p472_p4 = pnand %p471_p2, %p705_p12 }
 0x22e   : > { %p477_p6 = por %p476_p0, %p475_p7 }
 0x22f   : > { %p473_p9 = pneg %p472_p4 }
 0x231   : > { %p478_p11 = pnand %p477_p6, %p473_p9 }
 0x233   : > { %481 = shalt.err (!%p478_p11)
}
 0x234   : > { %374 = dma.vmem_to_hbm [thread:$0]  (%p705_p12), %s295_s4, 16, %s655_s7, %s282_s8  }
 0x235 PF: > { %s306_s29 = sand.u32 1, %s508_s9   ;;  %p706_p13 = scmp.ne.s32.totalorder %s700_s22, 0 }
 0x236   : > { %p707_p1 = scmp.ge.s32.totalorder %s520_s12, 2  ;;  %s307_s28 = scalar_lea.sflag [#allocation4], %s306_s29 }
 0x238   : > { %p381_p3 = pnand %p707_p1, %p706_p13 }
 0x23a   : > { %p382_p5 = pneg %p381_p3 }
 0x23c   : > { %503 = dma.done.wait (%p382_p5), %s307_s28, 16  }
 0x23d   : > { %505 = vsyncadd (%p382_p5), %s307_s28, 4294967280  ;;  %p15_p8 = scmp.ge.s32.totalorder %s566_s15, 4   ;;  %s708_s9 = smov %s512_s10 }
 0x23e   : > { %s709_s10 = smov %s516_s11  ;;  %s710_s11 = smov %s578_s18 }
 0x23f   : > { %s711_s12 = smov %s566_s15  ;;  %17 = sbr.rel (!%p15_p8) target bundleno = 5 (0x5), region = 73 }
 0x244   :  { %311 = vsyncpa [#allocation3], 1 }
 0x245   :  { %313 = vsyncpa [#allocation3 + $0x1], 1 }
 0x246   :  { %314 = vsyncpa [#allocation4], 1 }
 0x247   :  { %316 = vsyncpa [#allocation4 + $0x1], 1 }

</bundles_post_ra>
